<compile_context>
chip_gen: v6e
topology: v6e:2x2x1
jax: 0.10.0
libtpu: 0.0.40
codegen_flags: <defaults>
</compile_context>

<pallas_src>
import functools

import jax
import jax.numpy as jnp
from jax import lax
from jax.experimental import pallas as pl
from jax.experimental.pallas import tpu as pltpu


_K_FULL_MAX = 2048  # contraction dims up to this size use the single-shot 2-D grid


def _round_up(x: int, m: int) -> int:
    return ((x + m - 1) // m) * m


def _cdiv(a: int, b: int) -> int:
    return (a + b - 1) // b


# ---------------------------------------------------------------------------
# Kernels
# ---------------------------------------------------------------------------
def _matmul_kernel_2d(a_ref, b_ref, o_ref, *, compute_dtype):
    """Single-shot contraction: o[i,j] = A_tile(i) @ B_tile(j)^T (full K)."""
    a = a_ref[...]
    b = b_ref[...]
    if compute_dtype is not None:
        a = a.astype(compute_dtype)
        b = b.astype(compute_dtype)
    o_ref[...] = lax.dot_general(
        a, b, (((1,), (1,)), ((), ())),  # contract last dim of both (A @ B^T)
        preferred_element_type=jnp.float32,
    ).astype(o_ref.dtype)


def _matmul_kernel_3d(a_ref, b_ref, o_ref, acc_ref, *, compute_dtype):
    """K-tiled contraction with a resident f32 accumulator (large H only)."""
    @pl.when(pl.program_id(2) == 0)
    def _init():
        acc_ref[...] = jnp.zeros_like(acc_ref)

    a = a_ref[...]
    b = b_ref[...]
    if compute_dtype is not None:
        a = a.astype(compute_dtype)
        b = b.astype(compute_dtype)
    acc_ref[...] += lax.dot_general(
        a, b, (((1,), (1,)), ((), ())),
        preferred_element_type=jnp.float32,
    )

    @pl.when(pl.program_id(2) == pl.num_programs(2) - 1)
    def _finalize():
        o_ref[...] = acc_ref[...].astype(o_ref.dtype)


# ---------------------------------------------------------------------------
# Tiling heuristics
# ---------------------------------------------------------------------------
def _pick_tiles(Q: int, N: int, H: int, min_itemsize: int):
    sub = 8 if min_itemsize >= 4 else 16  # sublane granularity (f32 vs bf16)

    # M tile: multiple of 8/16 (or the full dim), capped at 512.
    if Q <= sub:
        tm = Q
    else:
        tm = min(512, _round_up(Q, sub))

    # N tile: lane-dense multiple of 128 (or the full dim when N <= 128).
    if N <= 128:
        tn = N
    else:
        tn = min(1024, _round_up(N, 128))
        # v7x megacore: if the row axis has only one block, make sure the
        # column axis still has >= 2 panels so both TensorCores get work.
        if _cdiv(Q, tm) == 1:
            tn = min(tn, max(128, _round_up(_cdiv(N, 2), 128)))

    # K tile: full H when it fits (single-shot path), else the 3-D path picks.
    tk = H if H <= _K_FULL_MAX else None
    return tm, tn, tk


def _pick_tk(H: int):
    """tk for the K-tiled path: prefer a divisor of H (no corpus padding)."""
    if H % 128 == 0:
        for tk in range(1024, 0, -128):
            if H % tk == 0:
                return tk, H
    # Rare: H > _K_FULL_MAX and not a multiple of 128 -> pad K to tk multiple.
    tk = 512
    return tk, _round_up(H, tk)


# ---------------------------------------------------------------------------
# Wrapper
# ---------------------------------------------------------------------------
def _similarity_scores_pallas(question_embedding, batch_embeddings, compute_dtype):
    Q, H = question_embedding.shape
    N, H2 = batch_embeddings.shape
    assert H == H2, "embedding dims must match"

    a = question_embedding
    b = batch_embeddings
    out_dtype = jnp.promote_types(a.dtype, b.dtype)
    qb = jnp.dtype(a.dtype).itemsize
    bb = jnp.dtype(b.dtype).itemsize
    ob = jnp.dtype(out_dtype).itemsize

    tm, tn, tk = _pick_tiles(Q, N, H, min(qb, ob))

    if tk is not None:
        # ---- Single-shot contraction: 2-D, fully parallel grid. ----
        grid = (_cdiv(Q, tm), _cdiv(N, tn))
        in_specs = [
            pl.BlockSpec((tm, H), lambda i, j: (i, 0)),   # question row panel
            pl.BlockSpec((tn, H), lambda i, j: (j, 0)),   # corpus panel, natural layout
        ]
        out_spec = pl.BlockSpec((tm, tn), lambda i, j: (i, j))
        kernel = functools.partial(_matmul_kernel_2d, compute_dtype=compute_dtype)
        scratch_shapes = []
        dim_sem = ("parallel", "parallel")
        vmem_bytes = 2 * (tm * H * qb + tn * H * bb) + 2 * tm * tn * ob
        Hp = H
    else:
        # ---- Large-H fallback: (i, j, k) grid with a resident f32 accumulator.
        tk, Hp = _pick_tk(H)
        if Hp != H:  # rare: H > 2048 and not a multiple of 128
            a = jnp.pad(a, ((0, 0), (0, Hp - H)))
            b = jnp.pad(b, ((0, 0), (0, Hp - H)))
        grid = (_cdiv(Q, tm), _cdiv(N, tn), Hp // tk)
        in_specs = [
            pl.BlockSpec((tm, tk), lambda i, j, k: (i, k)),
            pl.BlockSpec((tn, tk), lambda i, j, k: (j, k)),
        ]
        out_spec = pl.BlockSpec((tm, tn), lambda i, j, k: (i, j))
        kernel = functools.partial(_matmul_kernel_3d, compute_dtype=compute_dtype)
        scratch_shapes = [pltpu.VMEM((tm, tn), jnp.float32)]
        dim_sem = ("parallel", "parallel", "arbitrary")
        vmem_bytes = (2 * (tm * tk * qb + tn * tk * bb)
                      + 2 * tm * tn * ob + tm * tn * 4)

    # Explicit VMEM budget: raise small scoped defaults, but never exceed
    # 75% of physical VMEM (v7x has only 64 MiB per TensorCore).
    try:
        vmem_cap = int(pltpu.get_tpu_info().vmem_capacity_bytes)
    except Exception:  # pragma: no cover - conservative fallback
        vmem_cap = 64 * 1024 * 1024
    vmem_limit = int(min(max(int(1.5 * vmem_bytes), 32 * 1024 * 1024),
                         (3 * vmem_cap) // 4))

    cost = pl.CostEstimate(
        flops=2 * Q * N * Hp,
        transcendentals=0,
        bytes_accessed=Q * Hp * qb + N * Hp * bb + Q * N * ob,
    )

    # NOTE: pipeline_mode=pl.Buffered(3) on the corpus spec is a cheap extra
    # sweep if a trace ever shows exposed DMA waits; default double-buffering
    # is sufficient at these tile sizes.
    out = pl.pallas_call(
        kernel,
        out_shape=jax.ShapeDtypeStruct((Q, N), out_dtype),
        grid_spec=pltpu.PrefetchScalarGridSpec(
            num_scalar_prefetch=0,
            grid=grid,
            in_specs=in_specs,
            out_specs=out_spec,
            scratch_shapes=scratch_shapes,
        ),
        compiler_params=pltpu.CompilerParams(
            dimension_semantics=dim_sem,
            vmem_limit_bytes=vmem_limit,
        ),
        cost_estimate=cost,
    )(a, b)
    return out


@functools.partial(jax.jit, static_argnames=("compute_dtype",))
def similarity_scores(question_embedding, batch_embeddings, *, compute_dtype=None):
    """cos_scores = question_embedding @ batch_embeddings.T (SimilarityModel.forward)."""
    return _similarity_scores_pallas(question_embedding, batch_embeddings, compute_dtype)


# ---------------------------------------------------------------------------
# Self-test
# ---------------------------------------------------------------------------
if __name__ == "__main__":
    key = jax.random.PRNGKey(0)
    kq, kb = jax.random.split(key)

    # Small shapes consistent with the module: a few query rows, small corpus.
    Q, N, H = 8, 16, 32
    question_embedding = jax.random.normal(kq, (Q, H), dtype=jnp.float32)
    batch_embeddings = jax.random.normal(kb, (N, H), dtype=jnp.float32)
    ref = question_embedding @ batch_embeddings.T

    # 1) f32 path (single-shot 2-D grid).
    cos_scores = jax.block_until_ready(
        similarity_scores(question_embedding, batch_embeddings))
    assert cos_scores.shape == (Q, N)
    assert jnp.allclose(cos_scores, ref, atol=1e-5, rtol=1e-5)

    # 2) bf16 MXU inputs (cast inside the kernel, f32 accumulation).
    cos_scores_bf16 = jax.block_until_ready(
        similarity_scores(question_embedding, batch_embeddings,
                          compute_dtype=jnp.bfloat16))
    assert cos_scores_bf16.shape == (Q, N)
    assert jnp.allclose(cos_scores_bf16, ref, atol=1e-1, rtol=5e-2)

    # 3) Multi-panel corpus: exercises the partial-edge-block 2-D grid
    #    (grid_i == 1, so tn is capped to keep >= 2 column panels).
    kq2, kb2 = jax.random.split(jax.random.PRNGKey(1))
    Q2, N2, H2 = 8, 384, 256
    q2 = jax.random.normal(kq2, (Q2, H2), dtype=jnp.float32)
    b2 = jax.random.normal(kb2, (N2, H2), dtype=jnp.float32)
    out2 = jax.block_until_ready(similarity_scores(q2, b2))
    assert out2.shape == (Q2, N2)
    assert jnp.allclose(out2, q2 @ b2.T, atol=1e-3, rtol=1e-4)

    # 4) Large hidden dim: exercises the K-tiled accumulator fallback
    #    (H = 2304 > 2048, tk = 768 divides H -> 3 K steps, no padding).
    kq3, kb3 = jax.random.split(jax.random.PRNGKey(2))
    Q3, N3, H3 = 8, 256, 2304
    q3 = jax.random.normal(kq3, (Q3, H3), dtype=jnp.float32)
    b3 = jax.random.normal(kb3, (N3, H3), dtype=jnp.float32)
    out3 = jax.block_until_ready(similarity_scores(q3, b3))
    assert out3.shape == (Q3, N3)
    ref3 = jnp.matmul(q3, b3.T, precision=lax.Precision.HIGHEST)
    assert jnp.allclose(out3, ref3, atol=1e-2, rtol=1e-3)

    print("KERNEL_OK")
</pallas_src>

<mosaic_0001>
module attributes {stable_mosaic.version = 11 : i64} {
  func.func @_matmul_kernel_2d(%arg0: i32, %arg1: i32, %arg2: memref<8x32xf32, #tpu.memory_space<vmem>>, %arg3: memref<16x32xf32, #tpu.memory_space<vmem>>, %arg4: memref<8x16xf32, #tpu.memory_space<vmem>>) attributes {dimension_semantics = [#tpu.dimension_semantics<parallel>, #tpu.dimension_semantics<parallel>], iteration_bounds = array<i64: 1, 1>, scalar_prefetch = 0 : i64, scratch_operands = 0 : i64, tpu.core_type = #tpu.core_type<tc>, window_params = [{transform_indices = @transform_0, window_bounds = array<i64: 8, 32>}, {transform_indices = @transform_1, window_bounds = array<i64: 16, 32>}, {transform_indices = @transform_2, window_bounds = array<i64: 8, 16>}]} {
    %c0 = arith.constant 0 : index
    %c0_0 = arith.constant 0 : index
    %0 = vector.load %arg2[%c0, %c0_0] : memref<8x32xf32, #tpu.memory_space<vmem>>, vector<8x32xf32>
    %c0_1 = arith.constant 0 : index
    %c0_2 = arith.constant 0 : index
    %1 = vector.load %arg3[%c0_1, %c0_2] : memref<16x32xf32, #tpu.memory_space<vmem>>, vector<16x32xf32>
    %cst = arith.constant dense<0.000000e+00> : vector<8x16xf32>
    %2 = tpu.matmul %0, %1, %cst {dimension_numbers = #tpu.dot_dimension_numbers<[1], [1], [0], [0], [0, 0, 1, 0], [], []>} : vector<8x32xf32>, vector<16x32xf32>, vector<8x16xf32> -> vector<8x16xf32>
    %c0_3 = arith.constant 0 : index
    %c0_4 = arith.constant 0 : index
    %3 = vector.load %arg4[%c0_3, %c0_4] : memref<8x16xf32, #tpu.memory_space<vmem>>, vector<8x16xf32>
    tpu.vector_store %arg4[%c0_3, %c0_4], %2 {strides = array<i32>} : memref<8x16xf32, #tpu.memory_space<vmem>>, vector<8x16xf32>,
    return
  }
  func.func @transform_0(%arg0: i32, %arg1: i32) -> (i32, i32) {
    %c0_i32 = arith.constant 0 : i32
    %c0_i32_0 = arith.constant 0 : i32
    return %arg0, %c0_i32 : i32, i32
  }
  func.func @transform_1(%arg0: i32, %arg1: i32) -> (i32, i32) {
    %c0_i32 = arith.constant 0 : i32
    %c0_i32_0 = arith.constant 0 : i32
    return %arg1, %c0_i32 : i32, i32
  }
  func.func @transform_2(%arg0: i32, %arg1: i32) -> (i32, i32) {
    %c0_i32 = arith.constant 0 : i32
    return %arg0, %arg1 : i32, i32
  }
}

</mosaic_0001>

<bundles_post_ra>
// kernel: similarity_scores.1
= control target key start
LH: loop header
LB: loop body
LE: loop exit
PB: predicated region body
PF: predicated region fallthrough
CT: control target
= control target key end

     0   :  { %7 = vsyncpa [#allocation3], 0  ;;  %s256_s0 = inlined_call_operand.hbm [shape: f32[8,32], index: 0, kind: input, shape index: {}]   ;;  %s257_s1 = inlined_call_operand.hbm [shape: f32[16,32], index: 1, kind: input, shape index: {}]   ;;  %s258_s2 = inlined_call_operand.hbm [shape: f32[8,16], index: 2, kind: output, shape index: {}]  }
   0x1   :  { %8 = vsyncpa [#allocation6], 0 }
   0x2   :  { %9 = vsyncpa [#allocation4], 0  ;;  %s225_s9 = smov [#allocation2]   ;;  %s226_s11 = smov [#allocation5]  }
   0x3   :  { %s16_s10 = sshll.u32 %s225_s9, 4  ;;  %s25_s12 = sshll.u32 %s226_s11, 4  ;;  %s17_s10 = int_to_ptr.vmem [resolvable:$true] %s16_s10  ;;  %s26_s12 = int_to_ptr.vmem [resolvable:$true] %s25_s12 }
   0x4   :  { %s167_s13 = scalar_lea.vmem %s17_s10, 128  ;;  %p172_p1 = scmp.lt.s32.totalorder %s17_s10, %s17_s10 }
   0x5   :  { %p168_p0 = scmp.ne.s32.totalorder %s17_s10, %s167_s13  ;;  %p173_p2 = scmp.lt.s32.totalorder %s167_s13, %s167_s13 }
   0x7   :  { %p174_p3 = por %p173_p2, %p172_p1 }
   0x9   :  { %p175_p4 = pnand %p174_p3, %p168_p0 }
   0xb   :  { %178 = shalt.err (!%p175_p4)
}
   0xc   :  { %19 = dma.hbm_to_vmem [thread:$0]  %s256_s0, 128, %s17_s10, [#allocation3]  }
   0xd   :  { %s187_s16 = scalar_lea.vmem %s26_s12, 256  ;;  %p192_p6 = scmp.lt.s32.totalorder %s26_s12, %s26_s12 }
   0xe   :  { %p188_p5 = scmp.ne.s32.totalorder %s26_s12, %s187_s16  ;;  %p193_p7 = scmp.lt.s32.totalorder %s187_s16, %s187_s16 }
  0x10   :  { %p194_p8 = por %p193_p7, %p192_p6 }
  0x12   :  { %p195_p9 = pnand %p194_p8, %p188_p5 }
  0x14   :  { %198 = shalt.err (!%p195_p9)
}
  0x15   :  { %s227_s17 = smov 128   ;;  %s228_s18 = smov 8  }
  0x16   :  { %31 = dma.hbm_to_vmem [thread:$0]  %s257_s1, 256, %s26_s12, [#allocation6], %s227_s17, %s227_s17, %s228_s18  }
  0x17   :  { %219 = dma.done.wait [#allocation3], 128  }
  0x18   :  { %220 = vsyncadd [#allocation3], 4294967168 }
  0x19   :  { %221 = dma.done.wait [#allocation6], 256  }
  0x1a   :  { %222 = vsyncadd [#allocation6], 4294967040  ;;  %v229_v0 = vmov 0.0   ;;  %vm230_vm0 = vmmov 0   ;;  %vm41_vm1 = vcmask 261120   ;;  %v40_v1 = vld [vmem:[#allocation5 + $0x8] sm:$0xff] }
  0x1b   :  { %145 = vmatprep.subr.mxu0 %v229_v0  ;;  %149 = vmatprep.mubr.msk.f32.mxu0 %vm230_vm0, %v229_v0  ;;  %v39_v2 = vld [vmem:[#allocation5] sm:$0xff]  ;;  %v38_v3 = vld [vmem:[#allocation2] sm:$0xff]  ;;  %s231_s0 = smov [#allocation7]   ;;  %vm121_vm2 = vcmask 130048  }
  0x1c   :  { %146 = vmatpush3.xpose.msk.msra.mxu0 %vm41_vm1, %v40_v1  ;;  %s129_s21 = sshll.u32 %s231_s0, 4  ;;  %s130_s21 = int_to_ptr.vmem [resolvable:$true] %s129_s21 }
  0x1d   :  { %147 = vmatprep.subr.mxu0 %v229_v0  ;;  %s199_s1 = scalar_lea.vmem %s130_s21, 128  ;;  %p204_p11 = scmp.lt.s32.totalorder %s130_s21, %s130_s21 }
  0x1e   :  { %p200_p10 = scmp.ne.s32.totalorder %s130_s21, %s199_s1  ;;  %p205_p12 = scmp.lt.s32.totalorder %s199_s1, %s199_s1 }
  0x20   :  { %148 = vmatpush3.xpose.msk.msra.mxu0 %vm41_vm1, %v39_v2  ;;  %p206_p13 = por %p205_p12, %p204_p11 }
  0x22   :  { %p207_p0 = pnand %p206_p13, %p200_p10 }
  0x23   :  { %150 = vmatmul.mubr.msk.f32.vlgmr.msra.gmra.mxu0 %vm41_vm1, %v38_v3 }
  0xe3   :  { %v117_v4 = vpop.f32.mrf.mxu0 }
  0xe4   :  { %122 = vst.msk [vmem:[#allocation7] sm:$0xff] %vm121_vm2, %v117_v4 }
  0xe5   :  { %v151_v5 = vpop.f32.mrf.mxu0 }
  0xe6   :  { %210 = shalt.err (!%p207_p0)
}
  0xe7   :  { %132 = dma.vmem_to_hbm [thread:$0]  %s130_s21, 128, %s258_s2, [#allocation4]  }
  0xe8   :  { %223 = dma.done.wait [#allocation4], 128  }
  0xe9   :  { %224 = vsyncadd [#allocation4], 4294967168 }
  0xea   :  { %136 = vsyncpa [#allocation3], 1 }
  0xeb   :  { %137 = vsyncpa [#allocation6], 1 }
  0xec   :  { %138 = vsyncpa [#allocation4], 1 }

</bundles_post_ra>
